<compile_context>
chip_gen: v5e
topology: v5e:2x2
jax: 0.10.0
libtpu: 0.0.40
codegen_flags: <defaults>
</compile_context>

<pallas_src>
import math

import jax
import jax.numpy as jnp
from jax.experimental import pallas as pl
from jax.experimental.pallas import tpu as pltpu

EPS = 1e-8    # eps added to sum-of-squares before rsqrt in l2_norm
LANE = 128
SUBLANE = 8


def _round_up(x, m):
    return (x + m - 1) // m * m


def _l2_norm(x):
    return x * jax.lax.rsqrt(jnp.sum(x * x, axis=-1, keepdims=True) + EPS)


def _device_kind():
    try:
        return jax.devices()[0].device_kind.lower()
    except Exception:
        return ""


def _vmem_physical_bytes():
    try:
        cap = int(pltpu.get_tpu_info().vmem_capacity_bytes)
        if cap > 0:
            return cap
    except Exception:
        pass
    kind = _device_kind()
    return (64 << 20) if "v7" in kind else (128 << 20)


def _vmem_cap_bytes():
    # ~20% headroom for compiler-internal scratch / Mosaic temporaries:
    # ~51 MiB on v7x (64 MiB physical), ~102 MiB on v5e/v6e (128 MiB physical).
    return int(_vmem_physical_bytes() * 0.8)


def _max_batch_tile():
    kind = _device_kind()
    if "v4" in kind or "v5" in kind:
        return 128      # matches the 128x128 MXUs; v5e is MXU-throughput bound
    if "v6" in kind:
        return 512      # 128 MiB VMEM: bigger tile halves per-step grid overhead
    return 256          # v7x: 64 MiB per-TC VMEM


def _pick_batch_tile(B):
    base = _max_batch_tile()
    if B >= 2 * base:
        return base
    # Small batch: split into >= 2 tiles where possible (keeps both v7x TCs /
    # megacore halves busy) and avoid padding a tiny batch with dead MXU rows.
    tm = _round_up(max(pl.cdiv(B, 2), 1), SUBLANE)
    return max(SUBLANE, min(base, tm))


def _select_k_tile(Dp, Dk, tm, cap_bytes):
    """Pick the bottleneck tile TK (multiple of 128) and padded bottleneck dim."""
    budget = int(cap_bytes * 0.85)
    dk_full = _round_up(Dk, LANE)
    fixed = (2 * tm * Dp * 2      # bf16 activation tiles (double-buffered)
             + 2 * tm * Dp * 4    # f32 output tiles (double-buffered)
             + tm * Dp * 4        # f32 accumulator scratch
             + Dp * 8)            # alpha
    # Whole bottleneck resident: weights single-buffered (constant index maps).
    if fixed + 4 * Dp * dk_full + tm * dk_full * 6 <= budget:
        return dk_full, dk_full
    # K-tiled: weight slabs double-buffered across k.
    for tk in (4096, 2048, 1024, 512, 256, 128):
        if tk < dk_full and fixed + 8 * Dp * tk + tm * tk * 6 <= budget:
            return tk, _round_up(Dk, tk)
    return LANE, _round_up(Dk, LANE)


# ---------------------------------------------------------------------------
# Kernel: grid = (batch_tiles, k_tiles); K axis is the reduction ("arbitrary").
# ---------------------------------------------------------------------------
def simba_v2_block_kernel(h_ref, w1t_ref, w2t_ref, alpha_ref, o_ref, acc_ref):
    k = pl.program_id(1)

    @pl.when(k == 0)
    def _init():
        acc_ref[...] = jnp.zeros_like(acc_ref)

    # linear1 (+ folded Scaler) on this bottleneck slab; bf16 MXU operands, f32 acc.
    h_mlp = jnp.dot(h_ref[...], w1t_ref[...],
                    preferred_element_type=jnp.float32)           # (TM, TK) f32
    # ReLU fused with bf16 downcast (exact per K-slab: scaler already folded into W1^T).
    h_act = jnp.maximum(h_mlp, 0.0).astype(jnp.bfloat16)
    # linear2 partial product, accumulated over the bottleneck axis.
    acc_ref[...] += jnp.dot(h_act, w2t_ref[...],
                            preferred_element_type=jnp.float32)   # (TM, Dp) f32

    @pl.when(k == pl.num_programs(1) - 1)
    def _finalize():
        h_in = h_ref[...].astype(jnp.float32)                     # (TM, Dp) f32
        h_tilde = _l2_norm(acc_ref[...])                          # padded lanes are 0 -> exact
        alpha = alpha_ref[...]                                    # (1, Dp) f32
        mixed = h_in + alpha * (h_tilde - h_in)
        o_ref[...] = _l2_norm(mixed).astype(o_ref.dtype)


# ---------------------------------------------------------------------------
# One-time parameter packing (hoisted out of the per-call wrapper)
# ---------------------------------------------------------------------------
def prepare_block_params(w1, scaler1, w2, lerp_scaler, *, scaler1_forward, lerp_forward,
                         max_batch_tile=None):
    """Transpose, fold Scaler into W1^T, zero-pad to lane/K-tile multiples, cast to bf16."""
    Dk, D = w1.shape                      # w1: (bottleneck, hidden) in PyTorch layout
    Dp = _round_up(D, LANE)
    tm_max = max_batch_tile or _max_batch_tile()
    TK, Dkp = _select_k_tile(Dp, Dk, tm_max, _vmem_cap_bytes())

    s1 = (scaler1 * scaler1_forward).astype(jnp.float32)                  # (Dk,)
    w1t = jnp.transpose(w1).astype(jnp.float32) * s1[None, :]             # (D, Dk), scaler folded
    w2t = jnp.transpose(w2).astype(jnp.float32)                           # (Dk, D)

    w1t_p = jnp.zeros((Dp, Dkp), jnp.bfloat16).at[:D, :Dk].set(w1t.astype(jnp.bfloat16))
    w2t_p = jnp.zeros((Dkp, Dp), jnp.bfloat16).at[:Dk, :D].set(w2t.astype(jnp.bfloat16))

    alpha = (lerp_scaler * lerp_forward).astype(jnp.float32)              # (D,)
    alpha_p = jnp.zeros((1, Dp), jnp.float32).at[0, :D].set(alpha)

    return dict(w1t=w1t_p, w2t=w2t_p, alpha=alpha_p,
                hidden_dim=D, bottleneck_dim=Dk, k_tile=TK, max_batch_tile=tm_max)


def _make_call(TM, TK, Dp, Dkp, rows, single_buffer_invariants, vmem_limit, cost):
    nk = Dkp // TK
    nb = pl.cdiv(rows, TM)

    inv_mode = pl.Buffered(1) if single_buffer_invariants else None
    w_mode = pl.Buffered(1) if (single_buffer_invariants and nk == 1) else None

    def spec(shape, imap, mode):
        if mode is None:
            return pl.BlockSpec(shape, imap)
        return pl.BlockSpec(shape, imap, pipeline_mode=mode)

    return pl.pallas_call(
        simba_v2_block_kernel,
        out_shape=jax.ShapeDtypeStruct((rows, Dp), jnp.float32),
        grid_spec=pltpu.PrefetchScalarGridSpec(
            num_scalar_prefetch=0,
            grid=(nb, nk),
            in_specs=[
                pl.BlockSpec((TM, Dp), lambda i, k: (i, 0)),       # activations (bf16)
                spec((Dp, TK), lambda i, k: (0, k), w_mode),       # W1^T (scaler folded)
                spec((TK, Dp), lambda i, k: (k, 0), w_mode),       # W2^T
                spec((1, Dp), lambda i, k: (0, 0), inv_mode),      # lerp alpha
            ],
            out_specs=pl.BlockSpec((TM, Dp), lambda i, k: (i, 0)),
            scratch_shapes=[pltpu.VMEM((TM, Dp), jnp.float32)],    # second-matmul accumulator
        ),
        compiler_params=pltpu.CompilerParams(
            dimension_semantics=("parallel", "arbitrary"),
            vmem_limit_bytes=vmem_limit,
        ),
        cost_estimate=cost,
    )


# ---------------------------------------------------------------------------
# Wrapper
# ---------------------------------------------------------------------------
def simba_v2_block(h_in, packed, *, batch_tile=None):
    B, D = h_in.shape
    assert D == packed["hidden_dim"]
    Dp, Dkp = packed["w1t"].shape
    TK = packed["k_tile"]

    TM = batch_tile or _pick_batch_tile(B)
    TM = min(TM, packed["max_batch_tile"])
    TM = max(SUBLANE, _round_up(TM, SUBLANE))

    needs_d_pad = (Dp != D)
    if needs_d_pad:
        rows = _round_up(B, TM)
        # Single wrapper-side copy fusing pad + bf16 cast; padded lanes/rows are exact zeros.
        h_arg = jnp.zeros((rows, Dp), jnp.bfloat16).at[:B, :D].set(h_in.astype(jnp.bfloat16))
    else:
        # Lane-aligned hidden dim: no materialized pad/slice.  A ragged batch tail is
        # handled by Pallas partial blocks (rows are independent; OOB writes dropped).
        rows = B
        h_arg = h_in.astype(jnp.bfloat16)

    nb = pl.cdiv(rows, TM)

    # VMEM: (possibly double-buffered) bf16 weight slabs + bf16 act / f32 out tiles
    # + f32 accumulator + in-flight intermediates, with headroom; clamp to per-chip cap.
    est = (2 * 2 * Dp * TK * 2
           + 2 * TM * Dp * 2 + 2 * TM * Dp * 4
           + TM * Dp * 4 + TM * TK * 6 + Dp * 8
           + (4 << 20))
    vmem_limit = int(min(_vmem_cap_bytes(), max(est, 32 << 20)))

    cost = pl.CostEstimate(
        flops=4 * rows * Dp * Dkp,                       # two matmuls
        transcendentals=2 * rows,                        # two rsqrt per row
        bytes_accessed=rows * Dp * 6 + nb * (2 * Dp * Dkp * 2) + Dp * 4)

    args = (h_arg, packed["w1t"], packed["w2t"], packed["alpha"])
    try:
        out_p = _make_call(TM, TK, Dp, Dkp, rows, True, vmem_limit, cost)(*args)
    except Exception:
        # Fallback for JAX versions that reject pl.Buffered(1) on invariant operands.
        out_p = _make_call(TM, TK, Dp, Dkp, rows, False, vmem_limit, cost)(*args)

    if needs_d_pad:
        return out_p[:B, :D]
    return out_p


# ---------------------------------------------------------------------------
# Parameter construction matching the PyTorch module
# ---------------------------------------------------------------------------
def make_params(key, hidden_dim, expansion_factor=4, num_total_blocks=4):
    bottleneck_dim = hidden_dim * expansion_factor
    k1, k2 = jax.random.split(key)

    orth = jax.nn.initializers.orthogonal()
    w1 = orth(k1, (bottleneck_dim, hidden_dim), jnp.float32)   # (out, in)
    w2 = orth(k2, (hidden_dim, bottleneck_dim), jnp.float32)

    # Scaler(bottleneck_dim, init=s, scale=s): param = ones*scale, forward mult = init/scale
    mlp_scale = math.sqrt(2.0 / bottleneck_dim) if bottleneck_dim > 0 else 1.0
    scaler1_param = jnp.full((bottleneck_dim,), mlp_scale, jnp.float32)
    scaler1_forward = mlp_scale / mlp_scale  # = 1.0

    # LERP(hidden_dim, init=lerp_init, scale=lerp_scale)
    lerp_init = 1.0 / (num_total_blocks + 1) if num_total_blocks > -1 else 0.5
    lerp_scale = 1.0 / math.sqrt(hidden_dim) if hidden_dim > 0 else 1.0
    lerp_param = jnp.full((hidden_dim,), lerp_scale, jnp.float32)
    lerp_forward = lerp_init / lerp_scale

    return dict(w1=w1, w2=w2, scaler1=scaler1_param, scaler1_forward=scaler1_forward,
                lerp_scaler=lerp_param, lerp_forward=lerp_forward)


def reference(h_in, p):
    h_mlp = h_in @ p["w1"].T
    h_s = h_mlp * (p["scaler1"] * p["scaler1_forward"])
    h_a = jnp.maximum(h_s, 0.0)
    h_out = h_a @ p["w2"].T
    h_tilde = _l2_norm(h_out)
    alpha = p["lerp_scaler"] * p["lerp_forward"]
    return _l2_norm(h_in + alpha * (h_tilde - h_in))


if __name__ == "__main__":
    hidden_dim = 32
    expansion_factor = 4
    batch = 8

    key = jax.random.PRNGKey(0)
    kx, kp = jax.random.split(key)
    h_in = jax.random.normal(kx, (batch, hidden_dim), jnp.float32)
    params = make_params(kp, hidden_dim, expansion_factor, num_total_blocks=4)

    packed = prepare_block_params(
        params["w1"], params["scaler1"], params["w2"], params["lerp_scaler"],
        scaler1_forward=params["scaler1_forward"], lerp_forward=params["lerp_forward"])

    out = simba_v2_block(h_in, packed)
    out = jax.block_until_ready(out)

    ref = reference(h_in, params)
    assert out.shape == (batch, hidden_dim)
    # bf16 MXU operands / bf16 activation transport (f32 accumulation & epilogue)
    # -> relaxed tolerance vs the f32 reference.
    assert jnp.allclose(out, ref, atol=2e-2, rtol=2e-2), float(jnp.max(jnp.abs(out - ref)))
    print("KERNEL_OK")
</pallas_src>

<mosaic_0001>
module attributes {stable_mosaic.version = 11 : i64} {
  func.func @simba_v2_block_kernel(%arg0: i32, %arg1: i32, %arg2: memref<8x128xbf16, #tpu.memory_space<vmem>>, %arg3: memref<128x128xbf16, #tpu.memory_space<vmem>>, %arg4: memref<128x128xbf16, #tpu.memory_space<vmem>>, %arg5: memref<1x128xf32, #tpu.memory_space<vmem>>, %arg6: memref<8x128xf32, #tpu.memory_space<vmem>>, %arg7: memref<8x128xf32, #tpu.memory_space<vmem>>) attributes {dimension_semantics = [#tpu.dimension_semantics<parallel>, #tpu.dimension_semantics<arbitrary>], iteration_bounds = array<i64: 1, 1>, scalar_prefetch = 0 : i64, scratch_operands = 1 : i64, tpu.core_type = #tpu.core_type<tc>, window_params = [{transform_indices = @transform_0, window_bounds = array<i64: 8, 128>}, {pipeline_mode = #tpu.pipeline_mode<synchronous>, transform_indices = @transform_1, window_bounds = array<i64: 128, 128>}, {pipeline_mode = #tpu.pipeline_mode<synchronous>, transform_indices = @transform_2, window_bounds = array<i64: 128, 128>}, {pipeline_mode = #tpu.pipeline_mode<synchronous>, transform_indices = @transform_3, window_bounds = array<i64: 1, 128>}, {transform_indices = @transform_4, window_bounds = array<i64: 8, 128>}]} {
    %c0_i32 = arith.constant 0 : i32
    %0 = arith.cmpi eq, %arg1, %c0_i32 : i32
    %1 = arith.extui %0 : i1 to i32
    %c0_i32_0 = arith.constant 0 : i32
    %2 = arith.cmpi ne, %1, %c0_i32_0 : i32
    scf.if %2 {
      %cst_14 = arith.constant 0.000000e+00 : f32
      %17 = vector.broadcast %cst_14 : f32 to vector<8x128xf32>
      %c0_15 = arith.constant 0 : index
      %c0_16 = arith.constant 0 : index
      %18 = vector.load %arg7[%c0_15, %c0_16] : memref<8x128xf32, #tpu.memory_space<vmem>>, vector<8x128xf32>
      tpu.vector_store %arg7[%c0_15, %c0_16], %17 {strides = array<i32>} : memref<8x128xf32, #tpu.memory_space<vmem>>, vector<8x128xf32>,
    } else {
    }
    %c0 = arith.constant 0 : index
    %c0_1 = arith.constant 0 : index
    %3 = vector.load %arg2[%c0, %c0_1] : memref<8x128xbf16, #tpu.memory_space<vmem>>, vector<8x128xbf16>
    %c0_2 = arith.constant 0 : index
    %c0_3 = arith.constant 0 : index
    %4 = vector.load %arg3[%c0_2, %c0_3] : memref<128x128xbf16, #tpu.memory_space<vmem>>, vector<128x128xbf16>
    %cst = arith.constant dense<0.000000e+00> : vector<8x128xf32>
    %5 = tpu.matmul %3, %4, %cst {dimension_numbers = #tpu.dot_dimension_numbers<[1], [0], [0], [1], [0, 0, 1, 1], [], []>} : vector<8x128xbf16>, vector<128x128xbf16>, vector<8x128xf32> -> vector<8x128xf32>
    %cst_4 = arith.constant 0.000000e+00 : f32
    %6 = vector.broadcast %cst_4 : f32 to vector<8x128xf32>
    %7 = arith.maximumf %5, %6 : vector<8x128xf32>
    %8 = arith.truncf %7 : vector<8x128xf32> to vector<8x128xbf16>
    %c0_5 = arith.constant 0 : index
    %c0_6 = arith.constant 0 : index
    %9 = vector.load %arg7[%c0_5, %c0_6] : memref<8x128xf32, #tpu.memory_space<vmem>>, vector<8x128xf32>
    %c0_7 = arith.constant 0 : index
    %c0_8 = arith.constant 0 : index
    %10 = vector.load %arg4[%c0_7, %c0_8] : memref<128x128xbf16, #tpu.memory_space<vmem>>, vector<128x128xbf16>
    %cst_9 = arith.constant dense<0.000000e+00> : vector<8x128xf32>
    %11 = tpu.matmul %8, %10, %cst_9 {dimension_numbers = #tpu.dot_dimension_numbers<[1], [0], [0], [1], [0, 0, 1, 1], [], []>} : vector<8x128xbf16>, vector<128x128xbf16>, vector<8x128xf32> -> vector<8x128xf32>
    %12 = arith.addf %9, %11 : vector<8x128xf32>
    %c0_10 = arith.constant 0 : index
    %c0_11 = arith.constant 0 : index
    %13 = vector.load %arg7[%c0_10, %c0_11] : memref<8x128xf32, #tpu.memory_space<vmem>>, vector<8x128xf32>
    tpu.vector_store %arg7[%c0_10, %c0_11], %12 {strides = array<i32>} : memref<8x128xf32, #tpu.memory_space<vmem>>, vector<8x128xf32>,
    %c0_i32_12 = arith.constant 0 : i32
    %14 = arith.cmpi eq, %arg1, %c0_i32_12 : i32
    %15 = arith.extui %14 : i1 to i32
    %c0_i32_13 = arith.constant 0 : i32
    %16 = arith.cmpi ne, %15, %c0_i32_13 : i32
    scf.if %16 {
      %c0_14 = arith.constant 0 : index
      %c0_15 = arith.constant 0 : index
      %17 = vector.load %arg2[%c0_14, %c0_15] : memref<8x128xbf16, #tpu.memory_space<vmem>>, vector<8x128xbf16>
      %18 = arith.extf %17 : vector<8x128xbf16> to vector<8x128xf32>
      %c0_16 = arith.constant 0 : index
      %c0_17 = arith.constant 0 : index
      %19 = vector.load %arg7[%c0_16, %c0_17] : memref<8x128xf32, #tpu.memory_space<vmem>>, vector<8x128xf32>
      %20 = arith.mulf %19, %19 : vector<8x128xf32>
      %cst_18 = arith.constant dense<0.000000e+00> : vector<8xf32>
      %21 = vector.multi_reduction <add>, %20, %cst_18 [1] : vector<8x128xf32> to vector<8xf32>
      %22 = vector.shape_cast %21 : vector<8xf32> to vector<8x1xf32>
      %cst_19 = arith.constant 9.99999993E-9 : f32
      %23 = vector.broadcast %cst_19 : f32 to vector<8x1xf32>
      %24 = arith.addf %22, %23 : vector<8x1xf32>
      %25 = math.rsqrt %24 : vector<8x1xf32>
      %26 = vector.broadcast %25 : vector<8x1xf32> to vector<8x128xf32>
      %27 = arith.mulf %19, %26 : vector<8x128xf32>
      %c0_20 = arith.constant 0 : index
      %c0_21 = arith.constant 0 : index
      %28 = vector.load %arg5[%c0_20, %c0_21] : memref<1x128xf32, #tpu.memory_space<vmem>>, vector<1x128xf32>
      %29 = arith.subf %27, %18 : vector<8x128xf32>
      %30 = vector.broadcast %28 : vector<1x128xf32> to vector<8x128xf32>
      %31 = arith.mulf %30, %29 : vector<8x128xf32>
      %32 = arith.addf %18, %31 : vector<8x128xf32>
      %33 = arith.mulf %32, %32 : vector<8x128xf32>
      %cst_22 = arith.constant dense<0.000000e+00> : vector<8xf32>
      %34 = vector.multi_reduction <add>, %33, %cst_22 [1] : vector<8x128xf32> to vector<8xf32>
      %35 = vector.shape_cast %34 : vector<8xf32> to vector<8x1xf32>
      %cst_23 = arith.constant 9.99999993E-9 : f32
      %36 = vector.broadcast %cst_23 : f32 to vector<8x1xf32>
      %37 = arith.addf %35, %36 : vector<8x1xf32>
      %38 = math.rsqrt %37 : vector<8x1xf32>
      %39 = vector.broadcast %38 : vector<8x1xf32> to vector<8x128xf32>
      %40 = arith.mulf %32, %39 : vector<8x128xf32>
      %c0_24 = arith.constant 0 : index
      %c0_25 = arith.constant 0 : index
      %41 = vector.load %arg6[%c0_24, %c0_25] : memref<8x128xf32, #tpu.memory_space<vmem>>, vector<8x128xf32>
      tpu.vector_store %arg6[%c0_24, %c0_25], %40 {strides = array<i32>} : memref<8x128xf32, #tpu.memory_space<vmem>>, vector<8x128xf32>,
    } else {
    }
    return
  }
  func.func @transform_0(%arg0: i32, %arg1: i32) -> (i32, i32) {
    %c0_i32 = arith.constant 0 : i32
    %c0_i32_0 = arith.constant 0 : i32
    return %arg0, %c0_i32 : i32, i32
  }
  func.func @transform_1(%arg0: i32, %arg1: i32) -> (i32, i32) {
    %c0_i32 = arith.constant 0 : i32
    %c0_i32_0 = arith.constant 0 : i32
    return %c0_i32, %arg1 : i32, i32
  }
  func.func @transform_2(%arg0: i32, %arg1: i32) -> (i32, i32) {
    %c0_i32 = arith.constant 0 : i32
    %c0_i32_0 = arith.constant 0 : i32
    return %arg1, %c0_i32 : i32, i32
  }
  func.func @transform_3(%arg0: i32, %arg1: i32) -> (i32, i32) {
    %c0_i32 = arith.constant 0 : i32
    %c0_i32_0 = arith.constant 0 : i32
    %c0_i32_1 = arith.constant 0 : i32
    return %c0_i32, %c0_i32_0 : i32, i32
  }
  func.func @transform_4(%arg0: i32, %arg1: i32) -> (i32, i32) {
    %c0_i32 = arith.constant 0 : i32
    %c0_i32_0 = arith.constant 0 : i32
    return %arg0, %c0_i32 : i32, i32
  }
}

module attributes {stable_mosaic.version = 11 : i64} {
  func.func @simba_v2_block_kernel(%arg0: i32, %arg1: i32, %arg2: memref<8x128xbf16, #tpu.memory_space<vmem>>, %arg3: memref<128x128xbf16, #tpu.memory_space<vmem>>, %arg4: memref<128x128xbf16, #tpu.memory_space<vmem>>, %arg5: memref<1x128xf32, #tpu.memory_space<vmem>>, %arg6: memref<8x128xf32, #tpu.memory_space<vmem>>, %arg7: memref<8x128xf32, #tpu.memory_space<vmem>>) attributes {dimension_semantics = [#tpu.dimension_semantics<parallel>, #tpu.dimension_semantics<arbitrary>], iteration_bounds = array<i64: 1, 1>, scalar_prefetch = 0 : i64, scratch_operands = 1 : i64, tpu.core_type = #tpu.core_type<tc>, window_params = [{transform_indices = @transform_0, window_bounds = array<i64: 8, 128>}, {transform_indices = @transform_1, window_bounds = array<i64: 128, 128>}, {transform_indices = @transform_2, window_bounds = array<i64: 128, 128>}, {pipeline_mode = #tpu.pipeline_mode<synchronous>, transform_indices = @transform_3, window_bounds = array<i64: 1, 128>}, {transform_indices = @transform_4, window_bounds = array<i64: 8, 128>}]} {
    %c0_i32 = arith.constant 0 : i32
    %0 = arith.cmpi eq, %arg1, %c0_i32 : i32
    %1 = arith.extui %0 : i1 to i32
    %c0_i32_0 = arith.constant 0 : i32
    %2 = arith.cmpi ne, %1, %c0_i32_0 : i32
    scf.if %2 {
      %cst_14 = arith.constant 0.000000e+00 : f32
      %17 = vector.broadcast %cst_14 : f32 to vector<8x128xf32>
      %c0_15 = arith.constant 0 : index
      %c0_16 = arith.constant 0 : index
      %18 = vector.load %arg7[%c0_15, %c0_16] : memref<8x128xf32, #tpu.memory_space<vmem>>, vector<8x128xf32>
      tpu.vector_store %arg7[%c0_15, %c0_16], %17 {strides = array<i32>} : memref<8x128xf32, #tpu.memory_space<vmem>>, vector<8x128xf32>,
    } else {
    }
    %c0 = arith.constant 0 : index
    %c0_1 = arith.constant 0 : index
    %3 = vector.load %arg2[%c0, %c0_1] : memref<8x128xbf16, #tpu.memory_space<vmem>>, vector<8x128xbf16>
    %c0_2 = arith.constant 0 : index
    %c0_3 = arith.constant 0 : index
    %4 = vector.load %arg3[%c0_2, %c0_3] : memref<128x128xbf16, #tpu.memory_space<vmem>>, vector<128x128xbf16>
    %cst = arith.constant dense<0.000000e+00> : vector<8x128xf32>
    %5 = tpu.matmul %3, %4, %cst {dimension_numbers = #tpu.dot_dimension_numbers<[1], [0], [0], [1], [0, 0, 1, 1], [], []>} : vector<8x128xbf16>, vector<128x128xbf16>, vector<8x128xf32> -> vector<8x128xf32>
    %cst_4 = arith.constant 0.000000e+00 : f32
    %6 = vector.broadcast %cst_4 : f32 to vector<8x128xf32>
    %7 = arith.maximumf %5, %6 : vector<8x128xf32>
    %8 = arith.truncf %7 : vector<8x128xf32> to vector<8x128xbf16>
    %c0_5 = arith.constant 0 : index
    %c0_6 = arith.constant 0 : index
    %9 = vector.load %arg7[%c0_5, %c0_6] : memref<8x128xf32, #tpu.memory_space<vmem>>, vector<8x128xf32>
    %c0_7 = arith.constant 0 : index
    %c0_8 = arith.constant 0 : index
    %10 = vector.load %arg4[%c0_7, %c0_8] : memref<128x128xbf16, #tpu.memory_space<vmem>>, vector<128x128xbf16>
    %cst_9 = arith.constant dense<0.000000e+00> : vector<8x128xf32>
    %11 = tpu.matmul %8, %10, %cst_9 {dimension_numbers = #tpu.dot_dimension_numbers<[1], [0], [0], [1], [0, 0, 1, 1], [], []>} : vector<8x128xbf16>, vector<128x128xbf16>, vector<8x128xf32> -> vector<8x128xf32>
    %12 = arith.addf %9, %11 : vector<8x128xf32>
    %c0_10 = arith.constant 0 : index
    %c0_11 = arith.constant 0 : index
    %13 = vector.load %arg7[%c0_10, %c0_11] : memref<8x128xf32, #tpu.memory_space<vmem>>, vector<8x128xf32>
    tpu.vector_store %arg7[%c0_10, %c0_11], %12 {strides = array<i32>} : memref<8x128xf32, #tpu.memory_space<vmem>>, vector<8x128xf32>,
    %c0_i32_12 = arith.constant 0 : i32
    %14 = arith.cmpi eq, %arg1, %c0_i32_12 : i32
    %15 = arith.extui %14 : i1 to i32
    %c0_i32_13 = arith.constant 0 : i32
    %16 = arith.cmpi ne, %15, %c0_i32_13 : i32
    scf.if %16 {
      %c0_14 = arith.constant 0 : index
      %c0_15 = arith.constant 0 : index
      %17 = vector.load %arg2[%c0_14, %c0_15] : memref<8x128xbf16, #tpu.memory_space<vmem>>, vector<8x128xbf16>
      %18 = arith.extf %17 : vector<8x128xbf16> to vector<8x128xf32>
      %c0_16 = arith.constant 0 : index
      %c0_17 = arith.constant 0 : index
      %19 = vector.load %arg7[%c0_16, %c0_17] : memref<8x128xf32, #tpu.memory_space<vmem>>, vector<8x128xf32>
      %20 = arith.mulf %19, %19 : vector<8x128xf32>
      %cst_18 = arith.constant dense<0.000000e+00> : vector<8xf32>
      %21 = vector.multi_reduction <add>, %20, %cst_18 [1] : vector<8x128xf32> to vector<8xf32>
      %22 = vector.shape_cast %21 : vector<8xf32> to vector<8x1xf32>
      %cst_19 = arith.constant 9.99999993E-9 : f32
      %23 = vector.broadcast %cst_19 : f32 to vector<8x1xf32>
      %24 = arith.addf %22, %23 : vector<8x1xf32>
      %25 = math.rsqrt %24 : vector<8x1xf32>
      %26 = vector.broadcast %25 : vector<8x1xf32> to vector<8x128xf32>
      %27 = arith.mulf %19, %26 : vector<8x128xf32>
      %c0_20 = arith.constant 0 : index
      %c0_21 = arith.constant 0 : index
      %28 = vector.load %arg5[%c0_20, %c0_21] : memref<1x128xf32, #tpu.memory_space<vmem>>, vector<1x128xf32>
      %29 = arith.subf %27, %18 : vector<8x128xf32>
      %30 = vector.broadcast %28 : vector<1x128xf32> to vector<8x128xf32>
      %31 = arith.mulf %30, %29 : vector<8x128xf32>
      %32 = arith.addf %18, %31 : vector<8x128xf32>
      %33 = arith.mulf %32, %32 : vector<8x128xf32>
      %cst_22 = arith.constant dense<0.000000e+00> : vector<8xf32>
      %34 = vector.multi_reduction <add>, %33, %cst_22 [1] : vector<8x128xf32> to vector<8xf32>
      %35 = vector.shape_cast %34 : vector<8xf32> to vector<8x1xf32>
      %cst_23 = arith.constant 9.99999993E-9 : f32
      %36 = vector.broadcast %cst_23 : f32 to vector<8x1xf32>
      %37 = arith.addf %35, %36 : vector<8x1xf32>
      %38 = math.rsqrt %37 : vector<8x1xf32>
      %39 = vector.broadcast %38 : vector<8x1xf32> to vector<8x128xf32>
      %40 = arith.mulf %32, %39 : vector<8x128xf32>
      %c0_24 = arith.constant 0 : index
      %c0_25 = arith.constant 0 : index
      %41 = vector.load %arg6[%c0_24, %c0_25] : memref<8x128xf32, #tpu.memory_space<vmem>>, vector<8x128xf32>
      tpu.vector_store %arg6[%c0_24, %c0_25], %40 {strides = array<i32>} : memref<8x128xf32, #tpu.memory_space<vmem>>, vector<8x128xf32>,
    } else {
    }
    return
  }
  func.func @transform_0(%arg0: i32, %arg1: i32) -> (i32, i32) {
    %c0_i32 = arith.constant 0 : i32
    %c0_i32_0 = arith.constant 0 : i32
    return %arg0, %c0_i32 : i32, i32
  }
  func.func @transform_1(%arg0: i32, %arg1: i32) -> (i32, i32) {
    %c0_i32 = arith.constant 0 : i32
    %c0_i32_0 = arith.constant 0 : i32
    return %c0_i32, %arg1 : i32, i32
  }
  func.func @transform_2(%arg0: i32, %arg1: i32) -> (i32, i32) {
    %c0_i32 = arith.constant 0 : i32
    %c0_i32_0 = arith.constant 0 : i32
    return %arg1, %c0_i32 : i32, i32
  }
  func.func @transform_3(%arg0: i32, %arg1: i32) -> (i32, i32) {
    %c0_i32 = arith.constant 0 : i32
    %c0_i32_0 = arith.constant 0 : i32
    %c0_i32_1 = arith.constant 0 : i32
    return %c0_i32, %c0_i32_0 : i32, i32
  }
  func.func @transform_4(%arg0: i32, %arg1: i32) -> (i32, i32) {
    %c0_i32 = arith.constant 0 : i32
    %c0_i32_0 = arith.constant 0 : i32
    return %arg0, %c0_i32 : i32, i32
  }
}

</mosaic_0001>

<bundles_post_ra>
// kernel: tpu_custom_call.1
= control target key start
LH: loop header
LB: loop body
LE: loop exit
PB: predicated region body
PF: predicated region fallthrough
CT: control target
= control target key end

     0   :  { %9 = vsyncpa [#allocation4], 0  ;;  %s529_s0 = inlined_call_operand.hbm [shape: bf16[8,128], index: 0, kind: input, shape index: {}]   ;;  %s530_s1 = inlined_call_operand.hbm [shape: bf16[128,128], index: 1, kind: input, shape index: {}]   ;;  %s531_s2 = inlined_call_operand.hbm [shape: bf16[128,128], index: 2, kind: input, shape index: {}]   ;;  %s532_s3 = inlined_call_operand.vmem [shape: f32[1,128], index: 3, kind: input, shape index: {}]   ;;  %s533_s4 = inlined_call_operand.hbm [shape: f32[8,128], index: 4, kind: output, shape index: {}]  }
   0x1   :  { %10 = vsyncpa [#allocation7], 0  ;;  %s27_s17 = sshll.u32 %s530_s1, 4  ;;  %s28_s17 = int_to_ptr.hbm [resolvable:$true] %s27_s17 }
   0x2   :  { %11 = vsyncpa [#allocation5], 0  ;;  %s483_s18 = smov [#allocation6]   ;;  %s17_s22 = sshll.u32 %s529_s0, 4  ;;  %s18_s22 = int_to_ptr.hbm [resolvable:$true] %s17_s22 }
   0x3   :  { %s29_s19 = sshll.u32 %s483_s18, 4  ;;  %s484_s23 = smov 64   ;;  %s30_s19 = int_to_ptr.vmem [resolvable:$true] %s29_s19 }
   0x4   :  { %s485_s24 = smov 4   ;;  %s486_s25 = smov [#allocation3]  }
   0x5   :  { %35 = dma.hbm_to_vmem [thread:$0]  %s28_s17, 1024, %s30_s19, [#allocation7], %s484_s23, %s484_s23, %s485_s24  }
   0x6   :  { %s19_s26 = sshll.u32 %s486_s25, 4  ;;  %s40_s29 = sshll.u32 %s531_s2, 4  ;;  %s20_s26 = int_to_ptr.vmem [resolvable:$true] %s19_s26  ;;  %s41_s29 = int_to_ptr.hbm [resolvable:$true] %s40_s29 }
   0x7   :  { %22 = dma.hbm_to_vmem [thread:$0]  %s18_s22, 64, %s20_s26, [#allocation4]  }
   0x8   :  { %s487_s1 = smov [#allocation8]  }
   0x9   :  { %s42_s30 = sshll.u32 %s487_s1, 4  ;;  %s43_s30 = int_to_ptr.vmem [resolvable:$true] %s42_s30 }
   0xa   :  { %48 = dma.hbm_to_vmem [thread:$0]  %s41_s29, 1024, %s43_s30, [#allocation7], %s484_s23, %s484_s23, %s485_s24  }
   0xb   :  { %477 = dma.done.wait [#allocation4], 64  }
   0xc   :  { %478 = vsyncadd [#allocation4], 4294967232 }
   0xd   :  { %479 = dma.done.wait [#allocation7], 2048  }
   0xe   :  { %480 = vsyncadd [#allocation7], 4294965248  ;;  %v361_v0 = vld [vmem:[#allocation6 + $0x38] sm:$0xff]  ;;  %v360_v1 = vld [vmem:[#allocation6 + $0x30] sm:$0xff]  ;;  %s488_s5 = smov [#allocation9]   ;;  %s279_s8 = sshll.u32 %s533_s4, 4  ;;  %s280_s8 = int_to_ptr.hbm [resolvable:$true] %s279_s8 }
   0xf   :  { %133 = vmatpush.bf16.msra.mxu0 %v361_v0  ;;  %v369_v2 = vld [vmem:[#allocation8 + $0x38] sm:$0xff]  ;;  %v368_v3 = vld [vmem:[#allocation8 + $0x30] sm:$0xff]  ;;  %v359_v4 = vld [vmem:[#allocation6 + $0x28] sm:$0xff]  ;;  %s277_s6 = sshll.u32 %s488_s5, 4  ;;  %s278_s6 = int_to_ptr.vmem [resolvable:$true] %s277_s6 }
  0x10   :  { %213 = vmatpush.bf16.msra.mxu1 %v369_v2  ;;  %v367_v5 = vld [vmem:[#allocation8 + $0x28] sm:$0xff]  ;;  %v358_v6 = vld [vmem:[#allocation6 + $0x20] sm:$0xff]  ;;  %v357_v8 = vld [vmem:[#allocation6 + $0x18] sm:$0xff] }
  0x11   :  { %v366_v7 = vld [vmem:[#allocation8 + $0x20] sm:$0xff]  ;;  %v365_v9 = vld [vmem:[#allocation8 + $0x18] sm:$0xff]  ;;  %v356_v10 = vld [vmem:[#allocation6 + $0x10] sm:$0xff] }
  0x12   :  { %v364_v11 = vld [vmem:[#allocation8 + $0x10] sm:$0xff]  ;;  %v355_v12 = vld [vmem:[#allocation6 + $0x8] sm:$0xff]  ;;  %v354_v14 = vld [vmem:[#allocation6] sm:$0xff] }
  0x13   :  { %134 = vmatpush.bf16.msra.mxu0 %v360_v1  ;;  %v363_v13 = vld [vmem:[#allocation8 + $0x8] sm:$0xff]  ;;  %v68_v15 = vld [vmem:[#allocation3] sm:$0xf]  ;;  %v362_v16 = vld [vmem:[#allocation8] sm:$0xff] }
  0x14   :  { %214 = vmatpush.bf16.msra.mxu1 %v368_v3  ;;  %v231_v31 = vld [vmem:[#allocation3] sm:$0xf] }
  0x15   :  { %v232_v33 = vunpack.c.l.bf16 %v231_v31  ;;  %v376_v36 = vld [vmem:[%s532_s3] ss:$0 sm:$0xff] }
  0x17   :  { %135 = vmatpush.bf16.msra.mxu0 %v359_v4 }
  0x18   :  { %215 = vmatpush.bf16.msra.mxu1 %v367_v5 }
  0x1b   :  { %136 = vmatpush.bf16.msra.mxu0 %v358_v6 }
  0x1c   :  { %216 = vmatpush.bf16.msra.mxu1 %v366_v7 }
  0x1f   :  { %137 = vmatpush.bf16.msra.mxu0 %v357_v8 }
  0x20   :  { %217 = vmatpush.bf16.msra.mxu1 %v365_v9 }
  0x23   :  { %138 = vmatpush.bf16.msra.mxu0 %v356_v10 }
  0x24   :  { %218 = vmatpush.bf16.msra.mxu1 %v364_v11 }
  0x27   :  { %139 = vmatpush.bf16.msra.mxu0 %v355_v12 }
  0x28   :  { %219 = vmatpush.bf16.msra.mxu1 %v363_v13 }
  0x2b   :  { %140 = vmatpush.bf16.msra.mxu0 %v354_v14 }
  0x2c   :  { %220 = vmatpush.bf16.msra.mxu1 %v362_v16 }
  0x2e   :  { %141 = vmatmul.bf16.vlgmr.msra.gmra.mxu0 %v68_v15 }
  0xab   :  { %v142_v17 = vpop.f32.mrf.mxu0 }
  0xac   :  { %v146_v18 = vmax.f32 %v142_v17, 0.0 }
  0xae   :  { %v147_v19 = vpack.c.bf16 %v146_v18, %v146_v18 }
  0xb0   :  { %221 = vmatmul.bf16.vlgmr.msra.gmra.mxu1 %v147_v19 }
  0xb3   :  { %v144_v20 = vpop.f32.mrf.mxu0 }
 0x12d   :  { %v222_v21 = vpop.f32.mrf.mxu1 }
 0x12e   :  { %v234_v22 = vmul.f32 %v222_v21, %v222_v21 }
 0x130   :  { %235 = vadd.xlane.f32.xlu0 %v234_v22 }
 0x135   :  { %v224_v23 = vpop.f32.mrf.mxu1 }
 0x1a3   :  { %v236_v24 = vpop.xlane.xlu0 %235 }
 0x1a4   :  { %v237_v25 = vadd.f32 1e-08, %v236_v24 }
 0x1a6   :  { %377 = vrsqrt.f32 %v237_v25  ;;  %vm244_vm1 = vweird.f32 %v237_v25 }
 0x1ac   :  { %v378_v26 = vpop.eup %377 }
 0x1ad   :  { %v239_v27 = vmul.f32 %v378_v26, %v237_v25  ;;  %vm245_vm0 = vweird.f32 %v378_v26 }
 0x1ae   :  { %vm246_vm2 = vmor %vm244_vm1, %vm245_vm0 }
 0x1af   :  { %v240_v28 = vmul.f32 %v378_v26, %v239_v27 }
 0x1b1   :  { %v241_v29 = vmul.f32 0.5, %v240_v28 }
 0x1b3   :  { %v242_v30 = vsub.f32 1.5, %v241_v29 }
 0x1b5   :  { %v243_v32 = vmul.f32 %v378_v26, %v242_v30 }
 0x1b7   :  { %v247_v34 = vsel %vm246_vm2, %v378_v26, %v243_v32 }
 0x1b8   :  { %v248_v35 = vmul.f32 %v247_v34, %v222_v21 }
 0x1ba   :  { %v250_v37 = vsub.f32 %v248_v35, %v232_v33 }
 0x1bc   :  { %v254_v38 = vmul.f32 %v376_v36, %v250_v37 }
 0x1be   :  { %v255_v39 = vadd.f32 %v254_v38, %v232_v33 }
 0x1c0   :  { %v256_v40 = vmul.f32 %v255_v39, %v255_v39 }
 0x1c2   :  { %257 = vadd.xlane.f32.xlu0 %v256_v40 }
 0x235   :  { %v258_v41 = vpop.xlane.xlu0 %257 }
 0x236   :  { %v259_v42 = vadd.f32 1e-08, %v258_v41 }
 0x238   :  { %379 = vrsqrt.f32 %v259_v42  ;;  %vm266_vm4 = vweird.f32 %v259_v42 }
 0x23e   :  { %v380_v43 = vpop.eup %379 }
 0x23f   :  { %v261_v44 = vmul.f32 %v380_v43, %v259_v42  ;;  %vm267_vm3 = vweird.f32 %v380_v43 }
 0x240   :  { %vm268_vm5 = vmor %vm266_vm4, %vm267_vm3 }
 0x241   :  { %v262_v45 = vmul.f32 %v380_v43, %v261_v44 }
 0x243   :  { %v263_v46 = vmul.f32 0.5, %v262_v45 }
 0x245   :  { %v264_v47 = vsub.f32 1.5, %v263_v46 }
 0x247   :  { %v265_v48 = vmul.f32 %v380_v43, %v264_v47 }
 0x249   :  { %v269_v49 = vsel %vm268_vm5, %v380_v43, %v265_v48 }
 0x24a   :  { %v270_v50 = vmul.f32 %v269_v49, %v255_v39 }
 0x24c   :  { %271 = vst [vmem:[#allocation9] sm:$0xff] %v270_v50 }
 0x24d   :  { %282 = dma.vmem_to_hbm [thread:$0]  %s278_s6, 128, %s280_s8, [#allocation5]  }
 0x24e   :  { %481 = dma.done.wait [#allocation5], 128  }
 0x24f   :  { %482 = vsyncadd [#allocation5], 4294967168 }
 0x250   :  { %287 = vsyncpa [#allocation4], 1 }
 0x251   :  { %288 = vsyncpa [#allocation7], 1 }
 0x252   :  { %289 = vsyncpa [#allocation5], 1 }

// kernel: tpu_custom_call.1
= control target key start
LH: loop header
LB: loop body
LE: loop exit
PB: predicated region body
PF: predicated region fallthrough
CT: control target
= control target key end

     0   :  { %9 = vsyncpa [#allocation4], 0  ;;  %s529_s0 = inlined_call_operand.hbm [shape: bf16[8,128], index: 0, kind: input, shape index: {}]   ;;  %s530_s1 = inlined_call_operand.hbm [shape: bf16[128,128], index: 1, kind: input, shape index: {}]   ;;  %s531_s2 = inlined_call_operand.hbm [shape: bf16[128,128], index: 2, kind: input, shape index: {}]   ;;  %s532_s3 = inlined_call_operand.vmem [shape: f32[1,128], index: 3, kind: input, shape index: {}]   ;;  %s533_s4 = inlined_call_operand.hbm [shape: f32[8,128], index: 4, kind: output, shape index: {}]  }
   0x1   :  { %10 = vsyncpa [#allocation7], 0  ;;  %s27_s17 = sshll.u32 %s530_s1, 4  ;;  %s28_s17 = int_to_ptr.hbm [resolvable:$true] %s27_s17 }
   0x2   :  { %11 = vsyncpa [#allocation5], 0  ;;  %s483_s18 = smov [#allocation6]   ;;  %s17_s22 = sshll.u32 %s529_s0, 4  ;;  %s18_s22 = int_to_ptr.hbm [resolvable:$true] %s17_s22 }
   0x3   :  { %s29_s19 = sshll.u32 %s483_s18, 4  ;;  %s484_s23 = smov 64   ;;  %s30_s19 = int_to_ptr.vmem [resolvable:$true] %s29_s19 }
   0x4   :  { %s485_s24 = smov 4   ;;  %s486_s25 = smov [#allocation3]  }
   0x5   :  { %35 = dma.hbm_to_vmem [thread:$0]  %s28_s17, 1024, %s30_s19, [#allocation7], %s484_s23, %s484_s23, %s485_s24  }
   0x6   :  { %s19_s26 = sshll.u32 %s486_s25, 4  ;;  %s40_s29 = sshll.u32 %s531_s2, 4  ;;  %s20_s26 = int_to_ptr.vmem [resolvable:$true] %s19_s26  ;;  %s41_s29 = int_to_ptr.hbm [resolvable:$true] %s40_s29 }
   0x7   :  { %22 = dma.hbm_to_vmem [thread:$0]  %s18_s22, 64, %s20_s26, [#allocation4]  }
   0x8   :  { %s487_s1 = smov [#allocation8]  }
   0x9   :  { %s42_s30 = sshll.u32 %s487_s1, 4  ;;  %s43_s30 = int_to_ptr.vmem [resolvable:$true] %s42_s30 }
   0xa   :  { %48 = dma.hbm_to_vmem [thread:$0]  %s41_s29, 1024, %s43_s30, [#allocation7], %s484_s23, %s484_s23, %s485_s24  }
   0xb   :  { %477 = dma.done.wait [#allocation4], 64  }
   0xc   :  { %478 = vsyncadd [#allocation4], 4294967232 }
   0xd   :  { %479 = dma.done.wait [#allocation7], 2048  }
   0xe   :  { %480 = vsyncadd [#allocation7], 4294965248  ;;  %v361_v0 = vld [vmem:[#allocation6 + $0x38] sm:$0xff]  ;;  %v360_v1 = vld [vmem:[#allocation6 + $0x30] sm:$0xff]  ;;  %s488_s5 = smov [#allocation9]   ;;  %s279_s8 = sshll.u32 %s533_s4, 4  ;;  %s280_s8 = int_to_ptr.hbm [resolvable:$true] %s279_s8 }
   0xf   :  { %133 = vmatpush.bf16.msra.mxu0 %v361_v0  ;;  %v369_v2 = vld [vmem:[#allocation8 + $0x38] sm:$0xff]  ;;  %v368_v3 = vld [vmem:[#allocation8 + $0x30] sm:$0xff]  ;;  %v359_v4 = vld [vmem:[#allocation6 + $0x28] sm:$0xff]  ;;  %s277_s6 = sshll.u32 %s488_s5, 4  ;;  %s278_s6 = int_to_ptr.vmem [resolvable:$true] %s277_s6 }
  0x10   :  { %213 = vmatpush.bf16.msra.mxu1 %v369_v2  ;;  %v367_v5 = vld [vmem:[#allocation8 + $0x28] sm:$0xff]  ;;  %v358_v6 = vld [vmem:[#allocation6 + $0x20] sm:$0xff]  ;;  %v357_v8 = vld [vmem:[#allocation6 + $0x18] sm:$0xff] }
  0x11   :  { %v366_v7 = vld [vmem:[#allocation8 + $0x20] sm:$0xff]  ;;  %v365_v9 = vld [vmem:[#allocation8 + $0x18] sm:$0xff]  ;;  %v356_v10 = vld [vmem:[#allocation6 + $0x10] sm:$0xff] }
  0x12   :  { %v364_v11 = vld [vmem:[#allocation8 + $0x10] sm:$0xff]  ;;  %v355_v12 = vld [vmem:[#allocation6 + $0x8] sm:$0xff]  ;;  %v354_v14 = vld [vmem:[#allocation6] sm:$0xff] }
  0x13   :  { %134 = vmatpush.bf16.msra.mxu0 %v360_v1  ;;  %v363_v13 = vld [vmem:[#allocation8 + $0x8] sm:$0xff]  ;;  %v68_v15 = vld [vmem:[#allocation3] sm:$0xf]  ;;  %v362_v16 = vld [vmem:[#allocation8] sm:$0xff] }
  0x14   :  { %214 = vmatpush.bf16.msra.mxu1 %v368_v3  ;;  %v231_v31 = vld [vmem:[#allocation3] sm:$0xf] }
  0x15   :  { %v232_v33 = vunpack.c.l.bf16 %v231_v31  ;;  %v376_v36 = vld [vmem:[%s532_s3] ss:$0 sm:$0xff] }
  0x17   :  { %135 = vmatpush.bf16.msra.mxu0 %v359_v4 }
  0x18   :  { %215 = vmatpush.bf16.msra.mxu1 %v367_v5 }
  0x1b   :  { %136 = vmatpush.bf16.msra.mxu0 %v358_v6 }
  0x1c   :  { %216 = vmatpush.bf16.msra.mxu1 %v366_v7 }
  0x1f   :  { %137 = vmatpush.bf16.msra.mxu0 %v357_v8 }
  0x20   :  { %217 = vmatpush.bf16.msra.mxu1 %v365_v9 }
  0x23   :  { %138 = vmatpush.bf16.msra.mxu0 %v356_v10 }
  0x24   :  { %218 = vmatpush.bf16.msra.mxu1 %v364_v11 }
  0x27   :  { %139 = vmatpush.bf16.msra.mxu0 %v355_v12 }
  0x28   :  { %219 = vmatpush.bf16.msra.mxu1 %v363_v13 }
  0x2b   :  { %140 = vmatpush.bf16.msra.mxu0 %v354_v14 }
  0x2c   :  { %220 = vmatpush.bf16.msra.mxu1 %v362_v16 }
  0x2e   :  { %141 = vmatmul.bf16.vlgmr.msra.gmra.mxu0 %v68_v15 }
  0xab   :  { %v142_v17 = vpop.f32.mrf.mxu0 }
  0xac   :  { %v146_v18 = vmax.f32 %v142_v17, 0.0 }
  0xae   :  { %v147_v19 = vpack.c.bf16 %v146_v18, %v146_v18 }
  0xb0   :  { %221 = vmatmul.bf16.vlgmr.msra.gmra.mxu1 %v147_v19 }
  0xb3   :  { %v144_v20 = vpop.f32.mrf.mxu0 }
 0x12d   :  { %v222_v21 = vpop.f32.mrf.mxu1 }
 0x12e   :  { %v234_v22 = vmul.f32 %v222_v21, %v222_v21 }
 0x130   :  { %235 = vadd.xlane.f32.xlu0 %v234_v22 }
 0x135   :  { %v224_v23 = vpop.f32.mrf.mxu1 }
 0x1a3   :  { %v236_v24 = vpop.xlane.xlu0 %235 }
 0x1a4   :  { %v237_v25 = vadd.f32 1e-08, %v236_v24 }
 0x1a6   :  { %377 = vrsqrt.f32 %v237_v25  ;;  %vm244_vm1 = vweird.f32 %v237_v25 }
 0x1ac   :  { %v378_v26 = vpop.eup %377 }
 0x1ad   :  { %v239_v27 = vmul.f32 %v378_v26, %v237_v25  ;;  %vm245_vm0 = vweird.f32 %v378_v26 }
 0x1ae   :  { %vm246_vm2 = vmor %vm244_vm1, %vm245_vm0 }
 0x1af   :  { %v240_v28 = vmul.f32 %v378_v26, %v239_v27 }
 0x1b1   :  { %v241_v29 = vmul.f32 0.5, %v240_v28 }
 0x1b3   :  { %v242_v30 = vsub.f32 1.5, %v241_v29 }
 0x1b5   :  { %v243_v32 = vmul.f32 %v378_v26, %v242_v30 }
 0x1b7   :  { %v247_v34 = vsel %vm246_vm2, %v378_v26, %v243_v32 }
 0x1b8   :  { %v248_v35 = vmul.f32 %v247_v34, %v222_v21 }
 0x1ba   :  { %v250_v37 = vsub.f32 %v248_v35, %v232_v33 }
 0x1bc   :  { %v254_v38 = vmul.f32 %v376_v36, %v250_v37 }
 0x1be   :  { %v255_v39 = vadd.f32 %v254_v38, %v232_v33 }
 0x1c0   :  { %v256_v40 = vmul.f32 %v255_v39, %v255_v39 }
 0x1c2   :  { %257 = vadd.xlane.f32.xlu0 %v256_v40 }
 0x235   :  { %v258_v41 = vpop.xlane.xlu0 %257 }
 0x236   :  { %v259_v42 = vadd.f32 1e-08, %v258_v41 }
 0x238   :  { %379 = vrsqrt.f32 %v259_v42  ;;  %vm266_vm4 = vweird.f32 %v259_v42 }
 0x23e   :  { %v380_v43 = vpop.eup %379 }
 0x23f   :  { %v261_v44 = vmul.f32 %v380_v43, %v259_v42  ;;  %vm267_vm3 = vweird.f32 %v380_v43 }
 0x240   :  { %vm268_vm5 = vmor %vm266_vm4, %vm267_vm3 }
 0x241   :  { %v262_v45 = vmul.f32 %v380_v43, %v261_v44 }
 0x243   :  { %v263_v46 = vmul.f32 0.5, %v262_v45 }
 0x245   :  { %v264_v47 = vsub.f32 1.5, %v263_v46 }
 0x247   :  { %v265_v48 = vmul.f32 %v380_v43, %v264_v47 }
 0x249   :  { %v269_v49 = vsel %vm268_vm5, %v380_v43, %v265_v48 }
 0x24a   :  { %v270_v50 = vmul.f32 %v269_v49, %v255_v39 }
 0x24c   :  { %271 = vst [vmem:[#allocation9] sm:$0xff] %v270_v50 }
 0x24d   :  { %282 = dma.vmem_to_hbm [thread:$0]  %s278_s6, 128, %s280_s8, [#allocation5]  }
 0x24e   :  { %481 = dma.done.wait [#allocation5], 128  }
 0x24f   :  { %482 = vsyncadd [#allocation5], 4294967168 }
 0x250   :  { %287 = vsyncpa [#allocation4], 1 }
 0x251   :  { %288 = vsyncpa [#allocation7], 1 }
 0x252   :  { %289 = vsyncpa [#allocation5], 1 }

</bundles_post_ra>
